<compile_context>
chip_gen: v5e
topology: v5e:2x2
jax: 0.10.0
libtpu: 0.0.40
codegen_flags: <defaults>
</compile_context>

<pallas_src>
import functools

import jax
import jax.numpy as jnp
from jax.experimental import pallas as pl
from jax.experimental.pallas import tpu as pltpu


def _mha_kernel(*refs, n_heads, d_k, n_inputs, with_attn):
    # Unpack refs: [x inputs...] [wq bq wk bk wv bv wo3 bo] [out (, attn)]
    if n_inputs == 1:
        (xq_ref,) = refs[:1]
        xk_ref = xv_ref = xq_ref
    elif n_inputs == 2:
        xq_ref, xk_ref = refs[:2]
        xv_ref = xk_ref
    else:
        xq_ref, xk_ref, xv_ref = refs[:3]
    (wq_ref, bq_ref, wk_ref, bk_ref, wv_ref, bv_ref,
     wo_ref, bo_ref) = refs[n_inputs:n_inputs + 8]
    out_ref = refs[n_inputs + 8]
    attn_ref = refs[n_inputs + 9] if with_attn else None

    f32 = jnp.float32
    cdt = xq_ref.dtype                       # bf16 compute dtype for MXU operands
    H, dk = n_heads, d_k

    x_q = xq_ref[0]                                      # [tL, D]
    x_k = x_q if n_inputs == 1 else xk_ref[0]            # [S, D]
    x_v = x_k if n_inputs <= 2 else xv_ref[0]            # [S, D]

    # QKV projections: bf16 operands, f32 accumulation. The 1/sqrt(d_k) scale is
    # already folded into wq/bq on the host.
    q = jnp.dot(x_q, wq_ref[...], preferred_element_type=f32) + bq_ref[0]   # [tL, H*dk]
    k = jnp.dot(x_k, wk_ref[...], preferred_element_type=f32) + bk_ref[0]   # [S,  H*dk]
    v = jnp.dot(x_v, wv_ref[...], preferred_element_type=f32) + bv_ref[0]   # [S,  H*dk]

    tL = q.shape[0]
    S = k.shape[0]

    # Single relayout to head-batched [H, len, dk] (replaces per-head lane slices).
    qh = jnp.transpose(q.reshape(tL, H, dk), (1, 0, 2)).astype(cdt)
    kh = jnp.transpose(k.reshape(S, H, dk), (1, 0, 2)).astype(cdt)
    vh = jnp.transpose(v.reshape(S, H, dk), (1, 0, 2)).astype(cdt)

    # All heads' scores in one batched MXU contraction.
    s = jnp.einsum('hld,hsd->hls', qh, kh, preferred_element_type=f32)      # [H, tL, S]

    # Softmax in f32; divide moved onto the EUP.
    m = jnp.max(s, axis=-1, keepdims=True)
    e = jnp.exp(s - m)
    inv = pl.reciprocal(jnp.sum(e, axis=-1, keepdims=True), approx=True)
    attn = e * inv                                                          # [H, tL, S]

    if with_attn:
        attn_ref[0] = attn.astype(attn_ref.dtype)

    # attn @ V, batched over heads.
    ctx = jnp.einsum('hls,hsd->hld', attn.astype(cdt), vh,
                     preferred_element_type=f32)                            # [H, tL, dk]

    # Output projection with the head concat folded in:
    #   out = sum_h ctx[h] @ W_out[h*dk:(h+1)*dk, :]   (W_out pre-reshaped [H, dk, D])
    out_h = jnp.einsum('hld,hdm->hlm', ctx.astype(cdt), wo_ref[...],
                       preferred_element_type=f32)                          # [H, tL, D]
    out = jnp.sum(out_h, axis=0) + bo_ref[0]                                # [tL, D]
    out_ref[0] = out.astype(out_ref.dtype)


def multihead_attention(Q, K, V, params, n_heads, *, return_attn=True,
                        block_l=128, compute_dtype=jnp.bfloat16):
    """Q: [bs, L, D]; K/V: [bs, S, D] or None (self-attention).

    Returns (output [bs, L, D] f32, attn [bs, H, L, S] f32 or None)."""
    if K is None:
        K = Q
    if V is None:
        V = Q
    bs, L, D = Q.shape
    S = K.shape[1]
    assert D % n_heads == 0
    d_k = D // n_heads
    wq, bq, wk, bk, wv, bv, wo, bo = params
    scale = float(d_k) ** -0.5

    # Host-side prep: bf16 operands (halves HBM->VMEM DMA bytes), scale folded
    # into W_Q/b_Q, W_out split per head so the kernel never concatenates on lanes.
    wq_c = (wq * scale).astype(compute_dtype)
    wk_c = wk.astype(compute_dtype)
    wv_c = wv.astype(compute_dtype)
    wo_c = wo.reshape(n_heads, d_k, D).astype(compute_dtype)
    bq_c = (bq * scale).reshape(1, D).astype(jnp.float32)
    bk_c = bk.reshape(1, D).astype(jnp.float32)
    bv_c = bv.reshape(1, D).astype(jnp.float32)
    bo_c = bo.reshape(1, D).astype(jnp.float32)

    tL = L if L <= block_l else block_l
    n_l = pl.cdiv(L, tL)

    self_attn = (K is Q) and (V is Q) and (n_l == 1)
    shared_kv = (K is V) and not self_attn

    q_spec = pl.BlockSpec((1, tL, D), lambda b, l: (b, l, 0))
    kv_spec = pl.BlockSpec((1, S, D), lambda b, l: (b, 0, 0))

    if self_attn:
        x_inputs = [Q.astype(compute_dtype)]
        x_specs = [q_spec]                    # tL == L here
        n_inputs = 1
    elif shared_kv:
        x_inputs = [Q.astype(compute_dtype), K.astype(compute_dtype)]
        x_specs = [q_spec, kv_spec]
        n_inputs = 2
    else:
        x_inputs = [Q.astype(compute_dtype), K.astype(compute_dtype),
                    V.astype(compute_dtype)]
        x_specs = [q_spec, kv_spec, kv_spec]
        n_inputs = 3

    w_spec = pl.BlockSpec((D, D), lambda b, l: (0, 0))
    b_spec = pl.BlockSpec((1, D), lambda b, l: (0, 0))
    wo_spec = pl.BlockSpec((n_heads, d_k, D), lambda b, l: (0, 0, 0))

    out_shapes = [jax.ShapeDtypeStruct((bs, L, D), jnp.float32)]
    out_specs = [pl.BlockSpec((1, tL, D), lambda b, l: (b, l, 0))]
    if return_attn:
        out_shapes.append(jax.ShapeDtypeStruct((bs, n_heads, L, S), jnp.float32))
        out_specs.append(pl.BlockSpec((1, n_heads, tL, S), lambda b, l: (b, 0, l, 0)))

    kernel = functools.partial(_mha_kernel, n_heads=n_heads, d_k=d_k,
                               n_inputs=n_inputs, with_attn=return_attn)

    results = pl.pallas_call(
        kernel,
        out_shape=tuple(out_shapes),
        grid_spec=pltpu.PrefetchScalarGridSpec(
            num_scalar_prefetch=0,
            grid=(bs, n_l),
            in_specs=x_specs + [w_spec, b_spec, w_spec, b_spec, w_spec, b_spec,
                                wo_spec, b_spec],
            out_specs=out_specs,
        ),
        compiler_params=pltpu.CompilerParams(
            dimension_semantics=("parallel", "parallel")),
    )(*x_inputs, wq_c, bq_c, wk_c, bk_c, wv_c, bv_c, wo_c, bo_c)

    if return_attn:
        out, attn = results
        return out, attn
    (out,) = results
    return out, None


def _reference(Q, K, V, params, n_heads):
    """Pure-JAX f32 reference mirroring the PyTorch forward, for verification."""
    wq, bq, wk, bk, wv, bv, wo, bo = params
    bs, L, D = Q.shape
    d_k = D // n_heads
    q = (Q @ wq + bq).reshape(bs, L, n_heads, d_k).transpose(0, 2, 1, 3)   # [bs,H,L,dk]
    k = (K @ wk + bk).reshape(bs, -1, n_heads, d_k).transpose(0, 2, 3, 1)  # [bs,H,dk,S]
    v = (V @ wv + bv).reshape(bs, -1, n_heads, d_k).transpose(0, 2, 1, 3)  # [bs,H,S,dk]
    scores = jnp.einsum("bhld,bhds->bhls", q, k) * (d_k ** -0.5)
    attn = jax.nn.softmax(scores, axis=-1)
    out = jnp.einsum("bhls,bhsd->bhld", attn, v)
    out = out.transpose(0, 2, 1, 3).reshape(bs, L, n_heads * d_k)
    out = out @ wo + bo
    return out, attn


if __name__ == "__main__":
    bs, seq_len, d_model, n_heads = 2, 8, 32, 4

    key = jax.random.PRNGKey(0)
    keys = jax.random.split(key, 12)

    # Deterministic parameter init (nn.Linear-style shapes, stored as [in, out]).
    def init_w(k, shape, fan_in):
        return jax.random.uniform(k, shape, jnp.float32,
                                  -1.0 / (fan_in ** 0.5), 1.0 / (fan_in ** 0.5))

    wq = init_w(keys[0], (d_model, d_model), d_model)
    bq = init_w(keys[1], (1, d_model), d_model)
    wk = init_w(keys[2], (d_model, d_model), d_model)
    bk = init_w(keys[3], (1, d_model), d_model)
    wv = init_w(keys[4], (d_model, d_model), d_model)
    bv = init_w(keys[5], (1, d_model), d_model)
    wo = init_w(keys[6], (d_model, d_model), d_model)
    bo = init_w(keys[7], (1, d_model), d_model)
    params = (wq, bq, wk, bk, wv, bv, wo, bo)

    # --- Test A: self-attention (module's K=None, V=None path), attn returned. ---
    Q = jax.random.normal(keys[8], (bs, seq_len, d_model), jnp.float32)
    out, attn = multihead_attention(Q, None, None, params, n_heads)
    jax.block_until_ready(out)
    jax.block_until_ready(attn)

    ref_out, ref_attn = _reference(Q, Q, Q, params, n_heads)
    assert jnp.allclose(out, ref_out, atol=3e-2, rtol=3e-2), "self-attn output mismatch"
    assert jnp.allclose(attn, ref_attn, atol=2e-2, rtol=2e-2), "self-attn weights mismatch"

    # --- Test B: cross-attention with shared K=V, L tiled over the grid, no attn
    # writeback (flash-style store elision of the [bs,H,L,S] tensor). ---
    L2, S2 = 256, 16
    Q2 = jax.random.normal(keys[9], (bs, L2, d_model), jnp.float32)
    KV2 = jax.random.normal(keys[10], (bs, S2, d_model), jnp.float32)
    out2, _ = multihead_attention(Q2, KV2, KV2, params, n_heads,
                                  return_attn=False, block_l=128)
    jax.block_until_ready(out2)

    ref_out2, _ = _reference(Q2, KV2, KV2, params, n_heads)
    assert jnp.allclose(out2, ref_out2, atol=3e-2, rtol=3e-2), "cross-attn output mismatch"

    print("KERNEL_OK")
</pallas_src>

<mosaic_0001>
module attributes {stable_mosaic.version = 11 : i64} {
  func.func @_mha_kernel(%arg0: i32, %arg1: i32, %arg2: memref<1x8x32xbf16, #tpu.memory_space<vmem>>, %arg3: memref<32x32xbf16, #tpu.memory_space<vmem>>, %arg4: memref<1x32xf32, #tpu.memory_space<vmem>>, %arg5: memref<32x32xbf16, #tpu.memory_space<vmem>>, %arg6: memref<1x32xf32, #tpu.memory_space<vmem>>, %arg7: memref<32x32xbf16, #tpu.memory_space<vmem>>, %arg8: memref<1x32xf32, #tpu.memory_space<vmem>>, %arg9: memref<4x8x32xbf16, #tpu.memory_space<vmem>>, %arg10: memref<1x32xf32, #tpu.memory_space<vmem>>, %arg11: memref<1x8x32xf32, #tpu.memory_space<vmem>>, %arg12: memref<1x4x8x8xf32, #tpu.memory_space<vmem>>) attributes {dimension_semantics = [#tpu.dimension_semantics<parallel>, #tpu.dimension_semantics<parallel>], iteration_bounds = array<i64: 2, 1>, scalar_prefetch = 0 : i64, scratch_operands = 0 : i64, tpu.core_type = #tpu.core_type<tc>, window_params = [{transform_indices = @transform_0, window_bounds = array<i64: 1, 8, 32>}, {pipeline_mode = #tpu.pipeline_mode<synchronous>, transform_indices = @transform_1, window_bounds = array<i64: 32, 32>}, {pipeline_mode = #tpu.pipeline_mode<synchronous>, transform_indices = @transform_2, window_bounds = array<i64: 1, 32>}, {pipeline_mode = #tpu.pipeline_mode<synchronous>, transform_indices = @transform_3, window_bounds = array<i64: 32, 32>}, {pipeline_mode = #tpu.pipeline_mode<synchronous>, transform_indices = @transform_4, window_bounds = array<i64: 1, 32>}, {pipeline_mode = #tpu.pipeline_mode<synchronous>, transform_indices = @transform_5, window_bounds = array<i64: 32, 32>}, {pipeline_mode = #tpu.pipeline_mode<synchronous>, transform_indices = @transform_6, window_bounds = array<i64: 1, 32>}, {pipeline_mode = #tpu.pipeline_mode<synchronous>, transform_indices = @transform_7, window_bounds = array<i64: 4, 8, 32>}, {pipeline_mode = #tpu.pipeline_mode<synchronous>, transform_indices = @transform_8, window_bounds = array<i64: 1, 32>}, {transform_indices = @transform_9, window_bounds = array<i64: 1, 8, 32>}, {transform_indices = @transform_10, window_bounds = array<i64: 1, 4, 8, 8>}]} {
    %c0 = arith.constant 0 : index
    %c0_0 = arith.constant 0 : index
    %c0_1 = arith.constant 0 : index
    %0 = vector.load %arg2[%c0, %c0_0, %c0_1] : memref<1x8x32xbf16, #tpu.memory_space<vmem>>, vector<1x8x32xbf16>
    %1 = vector.shape_cast %0 : vector<1x8x32xbf16> to vector<8x32xbf16>
    %c0_2 = arith.constant 0 : index
    %c0_3 = arith.constant 0 : index
    %2 = vector.load %arg3[%c0_2, %c0_3] : memref<32x32xbf16, #tpu.memory_space<vmem>>, vector<32x32xbf16>
    %cst = arith.constant dense<0.000000e+00> : vector<8x32xf32>
    %3 = tpu.matmul %1, %2, %cst {dimension_numbers = #tpu.dot_dimension_numbers<[1], [0], [0], [1], [0, 0, 1, 1], [], []>} : vector<8x32xbf16>, vector<32x32xbf16>, vector<8x32xf32> -> vector<8x32xf32>
    %c0_4 = arith.constant 0 : index
    %c0_5 = arith.constant 0 : index
    %4 = vector.load %arg4[%c0_4, %c0_5] : memref<1x32xf32, #tpu.memory_space<vmem>>, vector<1x32xf32>
    %5 = vector.shape_cast %4 : vector<1x32xf32> to vector<32xf32>
    %6 = vector.shape_cast %5 : vector<32xf32> to vector<1x32xf32>
    %7 = vector.broadcast %6 : vector<1x32xf32> to vector<8x32xf32>
    %8 = arith.addf %3, %7 : vector<8x32xf32>
    %c0_6 = arith.constant 0 : index
    %c0_7 = arith.constant 0 : index
    %9 = vector.load %arg5[%c0_6, %c0_7] : memref<32x32xbf16, #tpu.memory_space<vmem>>, vector<32x32xbf16>
    %cst_8 = arith.constant dense<0.000000e+00> : vector<8x32xf32>
    %10 = tpu.matmul %1, %9, %cst_8 {dimension_numbers = #tpu.dot_dimension_numbers<[1], [0], [0], [1], [0, 0, 1, 1], [], []>} : vector<8x32xbf16>, vector<32x32xbf16>, vector<8x32xf32> -> vector<8x32xf32>
    %c0_9 = arith.constant 0 : index
    %c0_10 = arith.constant 0 : index
    %11 = vector.load %arg6[%c0_9, %c0_10] : memref<1x32xf32, #tpu.memory_space<vmem>>, vector<1x32xf32>
    %12 = vector.shape_cast %11 : vector<1x32xf32> to vector<32xf32>
    %13 = vector.shape_cast %12 : vector<32xf32> to vector<1x32xf32>
    %14 = vector.broadcast %13 : vector<1x32xf32> to vector<8x32xf32>
    %15 = arith.addf %10, %14 : vector<8x32xf32>
    %c0_11 = arith.constant 0 : index
    %c0_12 = arith.constant 0 : index
    %16 = vector.load %arg7[%c0_11, %c0_12] : memref<32x32xbf16, #tpu.memory_space<vmem>>, vector<32x32xbf16>
    %cst_13 = arith.constant dense<0.000000e+00> : vector<8x32xf32>
    %17 = tpu.matmul %1, %16, %cst_13 {dimension_numbers = #tpu.dot_dimension_numbers<[1], [0], [0], [1], [0, 0, 1, 1], [], []>} : vector<8x32xbf16>, vector<32x32xbf16>, vector<8x32xf32> -> vector<8x32xf32>
    %c0_14 = arith.constant 0 : index
    %c0_15 = arith.constant 0 : index
    %18 = vector.load %arg8[%c0_14, %c0_15] : memref<1x32xf32, #tpu.memory_space<vmem>>, vector<1x32xf32>
    %19 = vector.shape_cast %18 : vector<1x32xf32> to vector<32xf32>
    %20 = vector.shape_cast %19 : vector<32xf32> to vector<1x32xf32>
    %21 = vector.broadcast %20 : vector<1x32xf32> to vector<8x32xf32>
    %22 = arith.addf %17, %21 : vector<8x32xf32>
    %23 = vector.shape_cast %8 : vector<8x32xf32> to vector<8x4x8xf32>
    %24 = tpu.transpose %23, [1, 0, 2] : vector<8x4x8xf32> -> vector<4x8x8xf32>
    %25 = arith.truncf %24 : vector<4x8x8xf32> to vector<4x8x8xbf16>
    %26 = vector.shape_cast %15 : vector<8x32xf32> to vector<8x4x8xf32>
    %27 = tpu.transpose %26, [1, 0, 2] : vector<8x4x8xf32> -> vector<4x8x8xf32>
    %28 = arith.truncf %27 : vector<4x8x8xf32> to vector<4x8x8xbf16>
    %29 = vector.shape_cast %22 : vector<8x32xf32> to vector<8x4x8xf32>
    %30 = tpu.transpose %29, [1, 0, 2] : vector<8x4x8xf32> -> vector<4x8x8xf32>
    %31 = arith.truncf %30 : vector<4x8x8xf32> to vector<4x8x8xbf16>
    "tpu.trace_start"() <{level = 10 : i32, message = "hld,hsd->hls"}> : () -> ()
    %cst_16 = arith.constant dense<0.000000e+00> : vector<4x8x8xf32>
    %32 = tpu.matmul %25, %28, %cst_16 {dimension_numbers = #tpu.dot_dimension_numbers<[2], [2], [1], [1], [0, 0, 0, 1, 1, 1], [0], [0]>} : vector<4x8x8xbf16>, vector<4x8x8xbf16>, vector<4x8x8xf32> -> vector<4x8x8xf32>
    "tpu.trace_stop"() : () -> ()
    %cst_17 = arith.constant dense<0xFF800000> : vector<4x8xf32>
    %33 = vector.multi_reduction <maximumf>, %32, %cst_17 [2] : vector<4x8x8xf32> to vector<4x8xf32>
    %34 = vector.shape_cast %33 : vector<4x8xf32> to vector<4x8x1xf32>
    %35 = vector.broadcast %34 : vector<4x8x1xf32> to vector<4x8x8xf32>
    %36 = arith.subf %32, %35 : vector<4x8x8xf32>
    %37 = math.exp %36 : vector<4x8x8xf32>
    %cst_18 = arith.constant dense<0.000000e+00> : vector<4x8xf32>
    %38 = vector.multi_reduction <add>, %37, %cst_18 [2] : vector<4x8x8xf32> to vector<4x8xf32>
    %39 = vector.shape_cast %38 : vector<4x8xf32> to vector<4x8x1xf32>
    %40 = tpu.reciprocal %39 {approx = true} : vector<4x8x1xf32> -> vector<4x8x1xf32>
    %41 = vector.broadcast %40 : vector<4x8x1xf32> to vector<4x8x8xf32>
    %42 = arith.mulf %37, %41 : vector<4x8x8xf32>
    %c0_19 = arith.constant 0 : index
    %c0_20 = arith.constant 0 : index
    %c0_21 = arith.constant 0 : index
    %c0_22 = arith.constant 0 : index
    %43 = vector.load %arg12[%c0_19, %c0_20, %c0_21, %c0_22] : memref<1x4x8x8xf32, #tpu.memory_space<vmem>>, vector<1x4x8x8xf32>
    %44 = vector.shape_cast %43 : vector<1x4x8x8xf32> to vector<4x8x8xf32>
    %45 = vector.shape_cast %42 : vector<4x8x8xf32> to vector<1x4x8x8xf32>
    tpu.vector_store %arg12[%c0_19, %c0_20, %c0_21, %c0_22], %45 {strides = array<i32>} : memref<1x4x8x8xf32, #tpu.memory_space<vmem>>, vector<1x4x8x8xf32>,
    %46 = arith.truncf %42 : vector<4x8x8xf32> to vector<4x8x8xbf16>
    "tpu.trace_start"() <{level = 10 : i32, message = "hls,hsd->hld"}> : () -> ()
    %cst_23 = arith.constant dense<0.000000e+00> : vector<4x8x8xf32>
    %47 = tpu.matmul %46, %31, %cst_23 {dimension_numbers = #tpu.dot_dimension_numbers<[2], [1], [1], [2], [0, 0, 0, 1, 1, 2], [0], [0]>} : vector<4x8x8xbf16>, vector<4x8x8xbf16>, vector<4x8x8xf32> -> vector<4x8x8xf32>
    "tpu.trace_stop"() : () -> ()
    %48 = arith.truncf %47 : vector<4x8x8xf32> to vector<4x8x8xbf16>
    %c0_24 = arith.constant 0 : index
    %c0_25 = arith.constant 0 : index
    %c0_26 = arith.constant 0 : index
    %49 = vector.load %arg9[%c0_24, %c0_25, %c0_26] : memref<4x8x32xbf16, #tpu.memory_space<vmem>>, vector<4x8x32xbf16>
    "tpu.trace_start"() <{level = 10 : i32, message = "hld,hdm->hlm"}> : () -> ()
    %cst_27 = arith.constant dense<0.000000e+00> : vector<4x8x32xf32>
    %50 = tpu.matmul %48, %49, %cst_27 {dimension_numbers = #tpu.dot_dimension_numbers<[2], [1], [1], [2], [0, 0, 0, 1, 1, 2], [0], [0]>} : vector<4x8x8xbf16>, vector<4x8x32xbf16>, vector<4x8x32xf32> -> vector<4x8x32xf32>
    "tpu.trace_stop"() : () -> ()
    %cst_28 = arith.constant dense<0.000000e+00> : vector<8x32xf32>
    %51 = vector.multi_reduction <add>, %50, %cst_28 [0] : vector<4x8x32xf32> to vector<8x32xf32>
    %c0_29 = arith.constant 0 : index
    %c0_30 = arith.constant 0 : index
    %52 = vector.load %arg10[%c0_29, %c0_30] : memref<1x32xf32, #tpu.memory_space<vmem>>, vector<1x32xf32>
    %53 = vector.shape_cast %52 : vector<1x32xf32> to vector<32xf32>
    %54 = vector.shape_cast %53 : vector<32xf32> to vector<1x32xf32>
    %55 = vector.broadcast %54 : vector<1x32xf32> to vector<8x32xf32>
    %56 = arith.addf %51, %55 : vector<8x32xf32>
    %c0_31 = arith.constant 0 : index
    %c0_32 = arith.constant 0 : index
    %c0_33 = arith.constant 0 : index
    %57 = vector.load %arg11[%c0_31, %c0_32, %c0_33] : memref<1x8x32xf32, #tpu.memory_space<vmem>>, vector<1x8x32xf32>
    %58 = vector.shape_cast %57 : vector<1x8x32xf32> to vector<8x32xf32>
    %59 = vector.shape_cast %56 : vector<8x32xf32> to vector<1x8x32xf32>
    tpu.vector_store %arg11[%c0_31, %c0_32, %c0_33], %59 {strides = array<i32>} : memref<1x8x32xf32, #tpu.memory_space<vmem>>, vector<1x8x32xf32>,
    return
  }
  func.func @transform_0(%arg0: i32, %arg1: i32) -> (i32, i32, i32) {
    %c0_i32 = arith.constant 0 : i32
    %c0_i32_0 = arith.constant 0 : i32
    return %arg0, %arg1, %c0_i32 : i32, i32, i32
  }
  func.func @transform_1(%arg0: i32, %arg1: i32) -> (i32, i32) {
    %c0_i32 = arith.constant 0 : i32
    %c0_i32_0 = arith.constant 0 : i32
    %c0_i32_1 = arith.constant 0 : i32
    return %c0_i32, %c0_i32_0 : i32, i32
  }
  func.func @transform_2(%arg0: i32, %arg1: i32) -> (i32, i32) {
    %c0_i32 = arith.constant 0 : i32
    %c0_i32_0 = arith.constant 0 : i32
    %c0_i32_1 = arith.constant 0 : i32
    return %c0_i32, %c0_i32_0 : i32, i32
  }
  func.func @transform_3(%arg0: i32, %arg1: i32) -> (i32, i32) {
    %c0_i32 = arith.constant 0 : i32
    %c0_i32_0 = arith.constant 0 : i32
    %c0_i32_1 = arith.constant 0 : i32
    return %c0_i32, %c0_i32_0 : i32, i32
  }
  func.func @transform_4(%arg0: i32, %arg1: i32) -> (i32, i32) {
    %c0_i32 = arith.constant 0 : i32
    %c0_i32_0 = arith.constant 0 : i32
    %c0_i32_1 = arith.constant 0 : i32
    return %c0_i32, %c0_i32_0 : i32, i32
  }
  func.func @transform_5(%arg0: i32, %arg1: i32) -> (i32, i32) {
    %c0_i32 = arith.constant 0 : i32
    %c0_i32_0 = arith.constant 0 : i32
    %c0_i32_1 = arith.constant 0 : i32
    return %c0_i32, %c0_i32_0 : i32, i32
  }
  func.func @transform_6(%arg0: i32, %arg1: i32) -> (i32, i32) {
    %c0_i32 = arith.constant 0 : i32
    %c0_i32_0 = arith.constant 0 : i32
    %c0_i32_1 = arith.constant 0 : i32
    return %c0_i32, %c0_i32_0 : i32, i32
  }
  func.func @transform_7(%arg0: i32, %arg1: i32) -> (i32, i32, i32) {
    %c0_i32 = arith.constant 0 : i32
    %c0_i32_0 = arith.constant 0 : i32
    %c0_i32_1 = arith.constant 0 : i32
    %c0_i32_2 = arith.constant 0 : i32
    return %c0_i32, %c0_i32_0, %c0_i32_1 : i32, i32, i32
  }
  func.func @transform_8(%arg0: i32, %arg1: i32) -> (i32, i32) {
    %c0_i32 = arith.constant 0 : i32
    %c0_i32_0 = arith.constant 0 : i32
    %c0_i32_1 = arith.constant 0 : i32
    return %c0_i32, %c0_i32_0 : i32, i32
  }
  func.func @transform_9(%arg0: i32, %arg1: i32) -> (i32, i32, i32) {
    %c0_i32 = arith.constant 0 : i32
    %c0_i32_0 = arith.constant 0 : i32
    return %arg0, %arg1, %c0_i32 : i32, i32, i32
  }
  func.func @transform_10(%arg0: i32, %arg1: i32) -> (i32, i32, i32, i32) {
    %c0_i32 = arith.constant 0 : i32
    %c0_i32_0 = arith.constant 0 : i32
    %c0_i32_1 = arith.constant 0 : i32
    return %arg0, %c0_i32, %arg1, %c0_i32_0 : i32, i32, i32, i32
  }
}

</mosaic_0001>

<bundles_post_ra>
// kernel: tpu_custom_call.1
= control target key start
LH: loop header
LB: loop body
LE: loop exit
PB: predicated region body
PF: predicated region fallthrough
CT: control target
= control target key end

     0   :  { %s2392_s0 = inlined_call_operand.hbm [shape: bf16[2,8,32], index: 0, kind: input, shape index: {}]   ;;  %s2393_s1 = inlined_call_operand.hbm [shape: bf16[32,32], index: 1, kind: input, shape index: {}]   ;;  %s2394_s2 = inlined_call_operand.vmem [shape: f32[1,32], index: 2, kind: input, shape index: {}]   ;;  %s2395_s3 = inlined_call_operand.hbm [shape: bf16[32,32], index: 3, kind: input, shape index: {}]   ;;  %s2396_s4 = inlined_call_operand.vmem [shape: f32[1,32], index: 4, kind: input, shape index: {}]   ;;  %s2397_s5 = inlined_call_operand.hbm [shape: bf16[32,32], index: 5, kind: input, shape index: {}]   ;;  %s2398_s6 = inlined_call_operand.vmem [shape: f32[1,32], index: 6, kind: input, shape index: {}]   ;;  %s2399_s7 = inlined_call_operand.hbm [shape: bf16[4,8,32], index: 7, kind: input, shape index: {}]   ;;  %s2400_s8 = inlined_call_operand.vmem [shape: f32[1,32], index: 8, kind: input, shape index: {}]   ;;  %s2401_s9 = inlined_call_operand.hbm [shape: f32[2,8,32], index: 9, kind: output, shape index: {0}]   ;;  %s2402_s10 = inlined_call_operand.hbm [shape: f32[2,4,8,8], index: 10, kind: output, shape index: {1}]  }
   0x1   :  { %2405 = sst [smem:[#allocation20_spill]] %s2392_s0 }
   0x2   :  { %2406 = sst [smem:[#allocation21_spill]] %s2393_s1 }
   0x3   :  { %2407 = sst [smem:[#allocation22_spill]] %s2395_s3 }
   0x4   :  { %2408 = sst [smem:[#allocation23_spill]] %s2397_s5 }
   0x5   :  { %2409 = sst [smem:[#allocation24_spill]] %s2399_s7 }
   0x6   :  { %16 = vsyncpa [#allocation3], 0 }
   0x7   :  { %18 = vsyncpa [#allocation3 + $0x1], 0 }
   0x8   :  { %19 = vsyncpa [#allocation6], 0 }
   0x9   :  { %20 = vsyncpa [#allocation9], 0 }
   0xa   :  { %21 = vsyncpa [#allocation4], 0 }
   0xb   :  { %23 = vsyncpa [#allocation4 + $0x1], 0 }
   0xc   :  { %24 = vsyncpa [#allocation13], 0 }
   0xd   :  { %26 = vsyncpa [#allocation13 + $0x1], 0  ;;  %s1997_s13 = smov 0   ;;  %s1999_s14 = smov 0  }
   0xe   :  { %s2001_s15 = smov 0   ;;  %s2003_s16 = smov 0  }
   0xf   :  { %s2005_s17 = smov 0   ;;  %s2007_s18 = smov 0  }
  0x10 LB: > { %s2403_s19 = sadd.s32 4294967295, %s1927_s18   ;;  %p1449_p0 = scmp.ge.s32.totalorder %s1927_s18, 1  ;;  %s1927_s18 = sphi %s2007_s18, %s32_s18   ;;  %s1923_s17 = sphi %s2005_s17, %s2428_s17   ;;  %s1919_s16 = sphi %s2003_s16, %s2427_s16   ;;  %s1915_s15 = sphi %s2001_s15, %s2426_s15   ;;  %s1911_s14 = sphi %s1999_s14, %s2425_s14   ;;  %s1907_s13 = sphi %s1997_s13, %s2424_s13  }
  0x11   : > { %p2031_p1 = scmp.eq.s32.totalorder %s2403_s19, 0  ;;  %p301_p2 = scmp.lt.s32.totalorder %s1927_s18, 3 }
  0x12   : > { %s2411_s1 = sld [smem:[#allocation21_spill]]  ;;  %s1929_s25 = smov [#allocation5]  }
  0x13   : > { %p2039_p3 = pnand %p1449_p0, %p301_p2  ;;  %s314_s26 = sshll.u32 %s1929_s25, 4  ;;  %s315_s26 = int_to_ptr.vmem [resolvable:$true] %s314_s26 }
  0x14   : > { %p1454_p6 = scmp.ge.s32.totalorder %s1927_s18, 2  ;;  %s2414_s5 = sld [smem:[#allocation23_spill]] }
  0x15   : > { %p1540_p4 = pneg %p2039_p3  ;;  %s1930_s11 = smov 64  }
  0x16   : > { %s1931_s12 = smov 4   ;;  %s1932_s21 = smov [#allocation8]  }
  0x17   : > { %p2047_p5 = pnand %p1540_p4, %p2031_p1  ;;  %s348_s22 = sshll.u32 %s1932_s21, 4  ;;  %s349_s22 = int_to_ptr.vmem [resolvable:$true] %s348_s22 }
  0x18   : > { %s312_s23 = sshll.u32 %s2411_s1, 4  ;;  %s2415_s3 = sld [smem:[#allocation22_spill]]  ;;  %s313_s23 = int_to_ptr.hbm [resolvable:$true] %s312_s23 }
  0x19   : > { %1543 = dma.hbm_to_vmem [thread:$0]  (!%p2047_p5), %s313_s23, 256, %s315_s26, [#allocation6], %s1930_s11, %s1930_s11, %s1931_s12  }
  0x1a   : > { %s346_s30 = sshll.u32 %s2414_s5, 4  ;;  %s2416_s7 = sld [smem:[#allocation24_spill]]  ;;  %s347_s30 = int_to_ptr.hbm [resolvable:$true] %s346_s30 }
  0x1b   : > { %1549 = dma.hbm_to_vmem [thread:$0]  (!%p2047_p5), %s347_s30, 256, %s349_s22, [#allocation9], %s1930_s11, %s1930_s11, %s1931_s12  }
  0x1c   : > { %s1933_s26 = smov [#allocation7]   ;;  %s1934_s19 = smov [#allocation10]  }
  0x1d   : > { %s331_s21 = sshll.u32 %s1933_s26, 4  ;;  %s365_s25 = sshll.u32 %s1934_s19, 4  ;;  %s332_s21 = int_to_ptr.vmem [resolvable:$true] %s331_s21  ;;  %s366_s25 = int_to_ptr.vmem [resolvable:$true] %s365_s25 }
  0x1e   : > { %s329_s1 = sshll.u32 %s2415_s3, 4  ;;  %s44_s30 = sadd.s32 1, %s1923_s17  ;;  %s330_s1 = int_to_ptr.hbm [resolvable:$true] %s329_s1 }
  0x1f   : > { %1546 = dma.hbm_to_vmem [thread:$0]  (!%p2047_p5), %s330_s1, 256, %s332_s21, [#allocation6], %s1930_s11, %s1930_s11, %s1931_s12  }
  0x20   : > { %s363_s23 = sshll.u32 %s2416_s7, 4  ;;  %s1448_s22 = sadd.s32 4294967294, %s1927_s18   ;;  %s364_s23 = int_to_ptr.hbm [resolvable:$true] %s363_s23 }
  0x21   : > { %1552 = dma.hbm_to_vmem [thread:$0]  (!%p2047_p5), %s364_s23, 256, %s366_s25, [#allocation9], %s1930_s11, %s1930_s11, %s1931_s12  }
  0x22   : > { %p46_p7 = scmp.ge.s32.totalorder %s44_s30, 2  ;;  %s53_s28 = sadd.s32 1, %s1915_s15 }
  0x23   : > { %p60_p8 = scmp.ne.s32.totalorder %s1915_s15, %s1911_s14  ;;  %p61_p9 = scmp.eq.s32.totalorder %s1927_s18, 0 }
  0x24   : > { %s2430_s30 = smov (%p46_p7, %s44_s30), 0  ;;  %p66_p10 = scmp.ne.s32.totalorder %s1911_s14, %s1907_s13 }
  0x25   : > { %2417 = sst [smem:[#allocation19_spill]] %s2430_s30  ;;  %s48_s1 = ssub.s32 %s1923_s17, %s2430_s30 }
  0x26   : > { %s2418_s29 = sadd.s32 4294967295, %s1927_s18   ;;  %p51_p12 = scmp.eq.s32.totalorder %s48_s1, 0 }
  0x27   : > { %p260_p11 = scmp.eq.s32.totalorder %s2418_s29, 1  ;;  %p2085_p13 = por %p2031_p1, %p66_p10 }
  0x28   : > { %p266_p2 = scmp.eq.s32.totalorder %s1448_s22, 1  ;;  %p62_p4 = por %p61_p9, %p60_p8 }
  0x29   : > { %p2089_p0 = por %p260_p11, %p60_p8  ;;  %s382_s26 = sand.u32 1, %s1915_s15  }
  0x2a   : > { %s2094_s12 = scalar_select %p51_p12, %s1915_s15, %s53_s28  }
  0x2b   : > { %p2096_p5 = por %p266_p2, %p66_p10  ;;  %s1456_s21 = sshll.u32 %s1923_s17, 2 }
  0x2c   : > { %p1568_p7 = scmp.lt.s32.totalorder %s1927_s18, 2  ;;  %s1455_s19 = sshll.u32 %s382_s26, 2 }
  0x2d   : > { %s2422_s0 = sld [smem:[#allocation20_spill]]  ;;  %s386_s5 = scalar_lea.vmem [#allocation2], %s1455_s19 }
  0x2e   : > { %s395_s7 = sshll.u32 %s386_s5, 4  ;;  %p1554_p11 = pnand %p1568_p7, %p62_p4  ;;  %s396_s7 = int_to_ptr.vmem [resolvable:$true] %s395_s7 }
  0x2f   : > { %s383_s22 = scalar_lea.sflag [#allocation3], %s382_s26  ;;  %s2109_s28 = sand.u32 (!%p2039_p3), 1, %s1911_s14  }
  0x30   : > { %s1458_s30 = sshll.u32 (!%p2039_p3), %s2109_s28, 2  ;;  %s407_s25 = scalar_lea.sflag (!%p2039_p3), [#allocation3], %s2109_s28 }
  0x31   : > { %404 = sbr.rel (%p2039_p3) target bundleno = 1020 (0x3fc), region = 56 }
  0x33   : > { %s391_s29 = scalar_lea.hbm %s2422_s0, %s1456_s21  ;;  %s410_s21 = scalar_lea.vmem (!%p2039_p3), [#allocation2], %s1458_s30 }
  0x34   : > { %s393_s3 = sshll.u32 %s391_s29, 4  ;;  %s394_s3 = int_to_ptr.hbm [resolvable:$true] %s393_s3 }
  0x35   : > { %1556 = dma.hbm_to_vmem [thread:$0]  (!%p1554_p11), %s394_s3, 64, %s396_s7, %s383_s22  }
  0x36   : > { %1886 = dma.done.wait (%p2085_p13), %s407_s25, 64  }
  0x37   : > { %1888 = vsyncadd (%p2085_p13), %s407_s25, 4294967232 }
  0x38   : > { %1890 = dma.done.wait (%p2031_p1), [#allocation6], 512  }
  0x39   : > { %1892 = vsyncadd (%p2031_p1), [#allocation6], 4294966784 }
  0x3a   : > { %1894 = dma.done.wait (%p2031_p1), [#allocation9], 512  }
  0x3b   : > { %1896 = vsyncadd (%p2031_p1), [#allocation9], 4294966784  ;;  %v1512_v0 = vld [vmem:[#allocation5 + $0x8] sm:$0xff]  ;;  %v1514_v1 = vld [vmem:[#allocation7 + $0x8] sm:$0xff]  ;;  %vm495_vm0 = vcmask 261120   ;;  %s1935_s24 = smov 104  }
  0x3c   : > { %v1511_v2 = vld [vmem:[#allocation5] sm:$0xff]  ;;  %505 = vmatpush.bf16.msra.mxu0 %v1512_v0  ;;  %538 = vmatpush.bf16.msra.mxu1 %v1514_v1  ;;  %v1513_v3 = vld [vmem:[#allocation7] sm:$0xff]  ;;  %v474_v4 = vld [vmem:[%s410_s21] sm:$0xf]  ;;  %s1936_s30 = smov 120   ;;  %s1937_s27 = smov 112  }
  0x3d   : > { %v1635_v5 = vld [vmem:[%s2394_s2] ss:$0 sm:$0xff]  ;;  %v1516_v13 = vld [vmem:[#allocation8 + $0x8] sm:$0xff]  ;;  %v1515_v14 = vld [vmem:[#allocation8] sm:$0xff]  ;;  %v1938_v16 = vmov 1983009808  }
  0x3e   : > { %v1636_v6 = vld [vmem:[%s2396_s4] ss:$0 sm:$0xff]  ;;  %571 = vmatpush.bf16.msra.mxu2 %v1516_v13  ;;  %v594_v17 = vunpack.c.l.s4 %v1938_v16  ;;  %vm589_vm1 = vcmask 1047556   ;;  %v1939_v29 = vmov 1934713408   ;;  %vm951_vm2 = vcmask 64512  }
  0x3f   : > { %v618_v30 = vunpack.c.l.s4 %v1939_v29  ;;  %vm1083_vm3 = vcmask 1043456   ;;  %s1464_s1 = sshll.u32 %s2109_s28, 5  ;;  %s1517_s22 = sshll.u32 %s1919_s16, 5 }
  0x40   : > { %506 = vmatpush.bf16.msra.mxu0 %v1511_v2  ;;  %539 = vmatpush.bf16.msra.mxu1 %v1513_v3  ;;  %v2141_v25 = vunpack.c.0.s8 %v594_v17  ;;  %s2307_s29 = scalar_lea.vmem [#allocation12], %s1464_s1  ;;  %s1287_s3 = scalar_lea.hbm %s2402_s10, %s1517_s22 }
  0x41   : > { %v2150_v38 = vunpack.c.0.s8 %v618_v30  ;;  %s1288_s5 = sshll.u32 %s2307_s29, 4  ;;  %s1290_s7 = sshll.u32 %s1287_s3, 4  ;;  %s1289_s5 = int_to_ptr.vmem [resolvable:$true] %s1288_s5  ;;  %s1291_s7 = int_to_ptr.hbm [resolvable:$true] %s1290_s7 }
  0x42   : > { %572 = vmatpush.bf16.msra.mxu2 %v1515_v14  ;;  %s1260_s20 = scalar_lea.sflag [#allocation13], %s2109_s28  ;;  %s1825_s19 = scalar_lea.hbm %s2402_s10, 64 }
  0x43   : > { %1473 = vmatmul.msk.bf16.vlgmr.msra.gmra.mxu0 %vm495_vm0, %v474_v4  ;;  %1482 = vmatmul.msk.bf16.vlgmr.msra.gmra.mxu1 %vm495_vm0, %v474_v4 }
  0x45   : > { %1491 = vmatmul.msk.bf16.vlgmr.msra.gmra.mxu2 %vm495_vm0, %v474_v4 }
  0xc0   : > { %v508_v7 = vpop.f32.mrf.mxu0  ;;  %v541_v8 = vpop.f32.mrf.mxu1 }
  0xc1   : > { %v509_v9 = vadd.f32 %v1635_v5, %v508_v7  ;;  %v542_v10 = vadd.f32 %v1636_v6, %v541_v8 }
  0xc3   : > { %710 = vrot.lane.b32.xlu1 %v542_v10, %s1935_s24  ;;  %704 = vrot.lane.b32.xlu0 %v542_v10, %s1936_s30  ;;  %v591_v23 = vrot.slane %v509_v9, 4  ;;  %v715_v36 = vrot.slane %v542_v10, 4 }
  0xc4   : > { %582 = vrot.lane.b32.xlu2 %v509_v9, %s1937_s27 }
  0xc8   : > { %v543_v11 = vpop.f32.mrf.mxu1  ;;  %v510_v12 = vpop.f32.mrf.mxu0 }
  0xcb   : > { %707 = vrot.lane.b32.xlu0 %v542_v10, %s1937_s27  ;;  %579 = vrot.lane.b32.xlu1 %v509_v9, %s1936_s30 }
  0xcc   : > { %585 = vrot.lane.b32.xlu2 %v509_v9, %s1935_s24 }
 0x11e   : > { %v583_v15 = vpop.permute.xlu2 %582 }
 0x11f   : > { %v588_v18 = vrot.slane %v583_v15, 4  ;;  %v592_v31 = vsel %vm589_vm1, %v583_v15, %v591_v23 }
 0x120   : > { %v600_v37 = vperm.slane %v592_v31, %v2141_v25 }
 0x121   : > { %v590_v26 = vsel %vm589_vm1, %v588_v18, %v509_v9 }
 0x122   : > { %v596_v33 = vperm.slane %v590_v26, %v2141_v25  ;;  %v627_v56 = vrot.slane %v600_v37, 4 }
 0x124   : > { %v615_v48 = vrot.slane %v596_v33, 4 }
 0x126   : > { %v586_v27 = vpop.permute.xlu2 %585 }
 0x127   : > { %v601_v34 = vrot.slane %v586_v27, 4 }
 0x135   : > { %v711_v19 = vpop.permute.xlu1 %710  ;;  %v705_v20 = vpop.permute.xlu0 %704 }
 0x136   : > { %v725_v21 = vrot.slane %v711_v19, 4  ;;  %v727_v22 = vrot.slane %v705_v20, 4 }
 0x138   : > { %v728_v24 = vsel %vm589_vm1, %v711_v19, %v727_v22  ;;  %v726_v28 = vsel %vm589_vm1, %v725_v21, %v705_v20 }
 0x139   : > { %v736_v32 = vperm.slane %v728_v24, %v2141_v25  ;;  %v732_v35 = vperm.slane %v726_v28, %v2141_v25 }
 0x13b   : > { %v749_v45 = vrot.slane %v736_v32, 4  ;;  %v737_v49 = vrot.slane %v732_v35, 4 }
 0x13d   : > { %v708_v39 = vpop.permute.xlu0 %707  ;;  %v580_v40 = vpop.permute.xlu1 %579 }
 0x13e   : > { %v713_v41 = vrot.slane %v708_v39, 4  ;;  %v716_v42 = vsel %vm589_vm1, %v708_v39, %v715_v36  ;;  %v602_v43 = vsel %vm589_vm1, %v601_v34, %v580_v40  ;;  %v603_v44 = vrot.slane %v580_v40, 4 }
 0x13f   : > { %v724_v46 = vperm.slane %v716_v42, %v2141_v25  ;;  %v608_v47 = vperm.slane %v602_v43, %v2141_v25 }
 0x140   : > { %v714_v50 = vsel %vm589_vm1, %v713_v41, %v542_v10  ;;  %v604_v51 = vsel %vm589_vm1, %v586_v27, %v603_v44 }
 0x141   : > { %v720_v52 = vperm.slane %v714_v50, %v2141_v25  ;;  %v750_v53 = vsel %vm589_vm1, %v749_v45, %v724_v46  ;;  %v751_v54 = vrot.slane %v724_v46, 4  ;;  %v612_v55 = vperm.slane %v604_v51, %v2141_v25 }
 0x142   : > { %v756_v57 = vperm.slane %v750_v53, %v2150_v38  ;;  %v613_v58 = vrot.slane %v608_v47, 4  ;;  %v616_v59 = vsel %vm589_vm1, %v608_v47, %v615_v48 }
 0x143   : > { %v738_v60 = vsel %vm589_vm1, %v737_v49, %v720_v52  ;;  %v739_v61 = vrot.slane %v720_v52, 4  ;;  %v752_v62 = vsel %vm589_vm1, %v736_v32, %v751_v54  ;;  %v624_v63 = vperm.slane %v616_v59, %v2150_v38 }
 0x144   : > { %v744_v0 = vperm.slane %v738_v60, %v2150_v38  ;;  %v760_v1 = vperm.slane %v752_v62, %v2150_v38  ;;  %v765_v2 = vrot.slane %v756_v57, 4  ;;  %v614_v3 = vsel %vm589_vm1, %v613_v58, %v596_v33 }
 0x145   : > { %v740_v4 = vsel %vm589_vm1, %v732_v35, %v739_v61  ;;  %v620_v5 = vperm.slane %v614_v3, %v2150_v38  ;;  %v625_v6 = vrot.slane %v612_v55, 4  ;;  %v628_v7 = vsel %vm589_vm1, %v612_v55, %v627_v56 }
 0x146   : > { %v748_v8 = vperm.slane %v740_v4, %v2150_v38  ;;  %v761_v9 = vrot.slane %v744_v0, 4  ;;  %v766_v10 = vsel %vm589_vm1, 0.0, %v765_v2  ;;  %v767_v11 = vrot.slane %v760_v1, 4 }
 0x147   : > { %v626_v12 = vsel %vm589_vm1, %v625_v6, %v600_v37  ;;  %v636_v13 = vperm.slane %v628_v7, %v2150_v38  ;;  %v637_v14 = vrot.slane %v620_v5, 4  ;;  %v639_v15 = vrot.slane %v624_v63, 4 }
 0x148   : > { %v763_v16 = vrot.slane %v748_v8, 4  ;;  %v768_v17 = vsel %vm589_vm1, 0.0, %v767_v11  ;;  %v780_v18 = vsel %vm589_vm1, %v767_v11, %v756_v57  ;;  %v632_v19 = vperm.slane %v626_v12, %v2150_v38 }
 0x149   : > { %v784_v20 = vperm.slane %v780_v18, %v2141_v25  ;;  %v785_v21 = vrot.slane %v768_v17, 4  ;;  %v638_v22 = vsel %vm589_vm1, 0.0, %v637_v14  ;;  %v640_v23 = vsel %vm589_vm1, 0.0, %v639_v15 }
 0x14a   : > { %v764_v24 = vsel %vm589_vm1, 0.0, %v763_v16  ;;  %v641_v26 = vrot.slane %v632_v19, 4  ;;  %v643_v27 = vrot.slane %v636_v13, 4  ;;  %v645_v28 = vsel %vm589_vm1, %v639_v15, %v620_v5 }
 0x14b   : > { %v774_v29 = vrot.slane %v764_v24, 4  ;;  %v786_v30 = vsel %vm589_vm1, %v785_v21, %v766_v10  ;;  %v649_v31 = vperm.slane %v645_v28, %v2141_v25  ;;  %v650_v32 = vrot.slane %v640_v23, 4 }
 0x14c   : > { %v642_v33 = vsel %vm589_vm1, 0.0, %v641_v26  ;;  %v644_v34 = vsel %vm589_vm1, 0.0, %v643_v27  ;;  %v656_v35 = vsel %vm589_vm1, %v643_v27, %v632_v19  ;;  %v762_v36 = vsel %vm589_vm1, 0.0, %v761_v9 }
 0x14d   : > { %v651_v37 = vsel %vm589_vm1, %v650_v32, %v638_v22  ;;  %v660_v39 = vperm.slane %v656_v35, %v2141_v25  ;;  %v661_v40 = vrot.slane %v644_v34, 4  ;;  %v669_v41 = vrot.slane %v649_v31, 4 }
 0x14e   : > { %v655_v42 = vperm.slane %v651_v37, %v2141_v25  ;;  %v769_v43 = vsel %vm589_vm1, %v763_v16, %v744_v0  ;;  %v775_v44 = vsel %vm589_vm1, %v774_v29, %v762_v36  ;;  %v790_v45 = vperm.slane %v786_v30, %v2141_v25 }
 0x14f   : > { %v662_v46 = vsel %vm589_vm1, %v661_v40, %v642_v33  ;;  %v773_v47 = vperm.slane %v769_v43, %v2141_v25  ;;  %v779_v48 = vperm.slane %v775_v44, %v2141_v25  ;;  %v805_v49 = vrot.slane %v784_v20, 4 }
 0x150   : > { %v803_v50 = vrot.slane %v790_v45, 4  ;;  %v666_v51 = vperm.slane %v662_v46, %v2141_v25  ;;  %v681_v52 = vrot.slane %v660_v39, 4  ;;  %v670_v56 = vsel %vm589_vm1, %v655_v42, %v669_v41 }
 0x151   : > { %v793_v53 = vrot.slane %v773_v47, 4  ;;  %v806_v54 = vsel %vm589_vm1, %v790_v45, %v805_v49  ;;  %v791_v55 = vrot.slane %v779_v48, 4  ;;  %v667_v60 = vrot.slane %v655_v42, 4 }
 0x152   : > { %v814_v57 = vperm.slane %v806_v54, %v2150_v38  ;;  %v804_v58 = vsel %vm589_vm1, %v803_v50, %v784_v20  ;;  %v682_v59 = vsel %vm589_vm1, %v666_v51, %v681_v52  ;;  %v678_v6 = vperm.slane %v670_v56, %v2150_v38 }
 0x153   : > { %v794_v61 = vsel %vm589_vm1, %v779_v48, %v793_v53  ;;  %v792_v62 = vsel %vm589_vm1, %v791_v55, %v773_v47  ;;  %v810_v63 = vperm.slane %v804_v58, %v2150_v38  ;;  %v690_v0 = vperm.slane %v682_v59, %v2150_v38  ;;  %v1637_v53 = vld [vmem:[%s2398_s6] ss:$0 sm:$0xff] }
 0x154   : > { %v802_v1 = vperm.slane %v794_v61, %v2150_v38  ;;  %v819_v2 = vrot.slane %v814_v57, 4  ;;  %v798_v3 = vperm.slane %v792_v62, %v2150_v38  ;;  %v668_v4 = vsel %vm589_vm1, %v667_v60, %v649_v31 }
 0x155   : > { %v815_v5 = vrot.slane %v810_v63, 4  ;;  %v679_v7 = vrot.slane %v666_v51, 4  ;;  %v674_v11 = vperm.slane %v668_v4, %v2150_v38  ;;  %v695_v18 = vrot.slane %v690_v0, 4 }
 0x156   : > { %v820_v8 = vsel %vm589_vm1, %v819_v2, %v802_v1  ;;  %v821_v9 = vrot.slane %v802_v1, 4  ;;  %v817_v10 = vrot.slane %v798_v3, 4  ;;  %v697_v26 = vrot.slane %v678_v6, 4 }
 0x157   : > { %v825_v12 = vpack.c.bf16 %v820_v8, %v820_v8  ;;  %v816_v13 = vsel %vm589_vm1, %v815_v5, %v798_v3  ;;  %v680_v14 = vsel %vm589_vm1, %v679_v7, %v660_v39  ;;  %v693_v24 = vrot.slane %v674_v11, 4  ;;  %v574_v39 = vpop.f32.mrf.mxu2 }
 0x158   : > { %v823_v15 = vpack.c.bf16 %v816_v13, %v816_v13  ;;  %v822_v16 = vsel %vm589_vm1, %v814_v57, %v821_v9  ;;  %v818_v17 = vsel %vm589_vm1, %v810_v63, %v817_v10  ;;  %v686_v22 = vperm.slane %v680_v14, %v2150_v38 }
 0x159   : > { %v994_v19 = vsel %vm951_vm2, %v825_v12, 0  ;;  %v826_v20 = vpack.c.bf16 %v822_v16, %v822_v16  ;;  %v824_v21 = vpack.c.bf16 %v818_v17, %v818_v17  ;;  %v696_v30 = vsel %vm589_vm1, %v695_v18, %v678_v6 }
 0x15a   : > { %1003 = vmatpush.bf16.xpose.msrb.mxu1 %v994_v19  ;;  %v956_v23 = vsel %vm951_vm2, %v823_v15, 0  ;;  %v691_v29 = vrot.slane %v686_v22, 4  ;;  %v698_v32 = vsel %vm589_vm1, %v690_v0, %v697_v26  ;;  %v694_v33 = vsel %vm589_vm1, %v686_v22, %v693_v24 }
 0x15b   : > { %965 = vmatpush.bf16.xpose.msra.mxu3 %v956_v23  ;;  %v1013_v27 = vsel %vm951_vm2, %v826_v20, 0  ;;  %v975_v28 = vsel %vm951_vm2, %v824_v21, 0  ;;  %v701_v34 = vpack.c.bf16 %v696_v30, %v696_v30  ;;  %v702_v36 = vpack.c.bf16 %v698_v32, %v698_v32 }
 0x15c   : > { %1022 = vmatpush.bf16.xpose.msrb.mxu2 %v1013_v27  ;;  %984 = vmatpush.bf16.xpose.msrb.mxu0 %v975_v28  ;;  %v692_v31 = vsel %vm589_vm1, %v691_v29, %v674_v11  ;;  %v700_v37 = vpack.c.bf16 %v694_v33, %v694_v33  ;;  %v575_v54 = vadd.f32 %v1637_v53, %v574_v39 }
 0x15d   : > { %v699_v35 = vpack.c.bf16 %v692_v31, %v692_v31 }
 0x15e   : > { %v839_v18 = vrot.slane %v575_v54, 4 }
 0x15f   : > { %v576_v40 = vpop.f32.mrf.mxu2 }
 0x161   : > { %1494 = vmatmul.msk.bf16.vlgmr.msrb.gmra.mxu1 %vm951_vm2, %v701_v34 }
 0x162   : > { %1492 = vmatmul.msk.bf16.vlgmr.msra.gmra.mxu3 %vm951_vm2, %v699_v35 }
 0x163   : > { %1495 = vmatmul.msk.bf16.vlgmr.msrb.gmra.mxu2 %vm951_vm2, %v702_v36  ;;  %1493 = vmatmul.msk.bf16.vlgmr.msrb.gmra.mxu0 %vm951_vm2, %v700_v37 }
 0x1de   : > { %v1005_v41 = vpop.f32.mrf.mxu1 }
 0x1df   : > { %v1034_v42 = vsel %vm951_vm2, %v1005_v41, -inf }
 0x1e0   : > { %1035 = vmax.xlane.f32.xlu2 %v1034_v42  ;;  %v986_v43 = vpop.f32.mrf.mxu0 }
 0x1e1   : > { %v1031_v49 = vsel %vm951_vm2, %v986_v43, -inf }
 0x1e5   : > { %v967_v44 = vpop.f32.mrf.mxu3 }
 0x1e6   : > { %v1007_v45 = vpop.f32.mrf.mxu1  ;;  %v1024_v46 = vpop.f32.mrf.mxu2  ;;  %v1028_v47 = vsel %vm951_vm2, %v967_v44, -inf }
 0x1e7   : > { %v1037_v48 = vsel %vm951_vm2, %v1024_v46, -inf  ;;  %1029 = vmax.xlane.f32.xlu0 %v1028_v47 }
 0x1e8   : > { %1038 = vmax.xlane.f32.xlu1 %v1037_v48  ;;  %1032 = vmax.xlane.f32.xlu2 %v1031_v49  ;;  %v988_v50 = vpop.f32.mrf.mxu0 }
 0x1ed   : > { %v969_v51 = vpop.f32.mrf.mxu3 }
 0x1ee   : > { %v1026_v52 = vpop.f32.mrf.mxu2 }
 0x1fb   : > { %828 = vrot.lane.b32.xlu0 %v575_v54, %s1936_s30 }
 0x200   : > { %834 = vrot.lane.b32.xlu2 %v575_v54, %s1935_s24  ;;  %s1819_s24 = sshra.s32 %s1291_s7, 4  ;;  %s1820_s24 = int_to_ptr.hbm [resolvable:$true] %s1819_s24 }
 0x201   : > { %831 = vrot.lane.b32.xlu1 %v575_v54, %s1937_s27  ;;  %s1821_s30 = scalar_lea.hbm %s1820_s24, 32  ;;  %p1826_p9 = scmp.lt.s32.totalorder %s1820_s24, %s2402_s10 }
 0x202   : > { %p1822_p1 = scmp.ne.s32.totalorder %s1820_s24, %s1821_s30  ;;  %p1827_p10 = scmp.lt.s32.totalorder %s1825_s19, %s1821_s30 }
 0x204   : > { %p1823_p3 = pnand %p1822_p1, %p2089_p0  ;;  %p1828_p12 = por %p1827_p10, %p1826_p9 }
 0x206   : > { %p1824_p8 = pneg %p1823_p3 }
 0x208   : > { %p1829_p13 = pnand %p1828_p12, %p1824_p8 }
 0x253   : > { %v1036_v55 = vpop.xlane.xlu2 %1035 }
 0x254   : > { %v1042_v62 = vsub.f32 %v1005_v41, %v1036_v55 }
 0x256   : > { %v1048_v2 = vmul.f32 1.442695, %v1042_v62 }
 0x25a   : > { %v1030_v56 = vpop.xlane.xlu0 %1029 }
 0x25b   : > { %v1039_v57 = vpop.xlane.xlu1 %1038  ;;  %v1033_v58 = vpop.xlane.xlu2 %1032  ;;  %v1040_v59 = vsub.f32 %v967_v44, %v1030_v56 }
 0x25c   : > { %v1043_v60 = vsub.f32 %v1024_v46, %v1039_v57  ;;  %v1041_v61 = vsub.f32 %v986_v43, %v1033_v58 }
 0x25d   : > { %v1044_v63 = vmul.f32 1.442695, %v1040_v59 }
 0x25e   : > { %v1050_v0 = vmul.f32 1.442695, %v1043_v60  ;;  %v1046_v1 = vmul.f32 1.442695, %v1041_v61 }
 0x25f   : > { %1639 = vpow2.f32 %v1044_v63 }
 0x260   : > { %1641 = vpow2.f32 %v1050_v0 }
 0x261   : > { %1643 = vpow2.f32 %v1046_v1 }
 0x262   : > { %1645 = vpow2.f32 %v1048_v2 }
 0x263   : > { %v835_v10 = vpop.permute.xlu2 %834 }
 0x264   : > { %v849_v12 = vrot.slane %v835_v10, 4 }
 0x265   : > { %v2242_v3 = vpop.eup %1639 }
 0x266   : > { %v2244_v4 = vpop.eup %1641  ;;  %v1052_v5 = vsel %vm951_vm2, %v2242_v3, 0.0 }
 0x267   : > { %v2248_v6 = vpop.eup %1643  ;;  %v1061_v7 = vsel %vm951_vm2, %v2244_v4, 0.0  ;;  %1053 = vadd.xlane.f32.xlu0 %v1052_v5 }
 0x268   : > { %1062 = vadd.xlane.f32.xlu1 %v1061_v7  ;;  %v1055_v8 = vsel %vm951_vm2, %v2248_v6, 0.0  ;;  %v2254_v9 = vpop.eup %1645 }
 0x269   : > { %1056 = vadd.xlane.f32.xlu2 %v1055_v8  ;;  %v1058_v14 = vsel %vm951_vm2, %v2254_v9, 0.0 }
 0x26d   : > { %v829_v11 = vpop.permute.xlu0 %828 }
 0x26e   : > { %v851_v13 = vrot.slane %v829_v11, 4  ;;  %v850_v15 = vsel %vm589_vm1, %v849_v12, %v829_v11 }
 0x26f   : > { %1059 = vadd.xlane.f32.xlu0 %v1058_v14  ;;  %v856_v19 = vperm.slane %v850_v15, %v2141_v25 }
 0x270   : > { %v852_v16 = vsel %vm589_vm1, %v835_v10, %v851_v13 }
 0x271   : > { %v860_v17 = vperm.slane %v852_v16, %v2141_v25  ;;  %v861_v27 = vrot.slane %v856_v19, 4 }
 0x273   : > { %v873_v20 = vrot.slane %v860_v17, 4  ;;  %v832_v21 = vpop.permute.xlu1 %831 }
 0x274   : > { %v837_v22 = vrot.slane %v832_v21, 4  ;;  %v840_v23 = vsel %vm589_vm1, %v832_v21, %v839_v18 }
 0x275   : > { %v848_v24 = vperm.slane %v840_v23, %v2141_v25 }
 0x276   : > { %v838_v26 = vsel %vm589_vm1, %v837_v22, %v575_v54 }
 0x277   : > { %v844_v28 = vperm.slane %v838_v26, %v2141_v25  ;;  %v874_v29 = vsel %vm589_vm1, %v873_v20, %v848_v24  ;;  %v875_v30 = vrot.slane %v848_v24, 4  ;;  %v1161_v24 = vld [vmem:[#allocation10] sm:$0xf] }
 0x278   : > { %v880_v31 = vperm.slane %v874_v29, %v2150_v38  ;;  %v1169_v26 = vsel %vm1083_vm3, %v1161_v24, 0 }
 0x279   : > { %v862_v32 = vsel %vm589_vm1, %v861_v27, %v844_v28  ;;  %v863_v33 = vrot.slane %v844_v28, 4  ;;  %v876_v34 = vsel %vm589_vm1, %v860_v17, %v875_v30 }
 0x27a   : > { %v868_v35 = vperm.slane %v862_v32, %v2150_v38  ;;  %v884_v36 = vperm.slane %v876_v34, %v2150_v38  ;;  %v889_v40 = vrot.slane %v880_v31, 4 }
 0x27b   : > { %v864_v37 = vsel %vm589_vm1, %v856_v19, %v863_v33 }
 0x27c   : > { %v872_v39 = vperm.slane %v864_v37, %v2150_v38  ;;  %v891_v41 = vrot.slane %v884_v36, 4  ;;  %v885_v42 = vrot.slane %v868_v35, 4  ;;  %v890_v49 = vsel %vm589_vm1, 0.0, %v889_v40 }
 0x27e   : > { %v887_v43 = vrot.slane %v872_v39, 4  ;;  %v892_v44 = vsel %vm589_vm1, 0.0, %v891_v41  ;;  %v904_v45 = vsel %vm589_vm1, %v891_v41, %v880_v31  ;;  %v886_v55 = vsel %vm589_vm1, 0.0, %v885_v42  ;;  %v1162_v41 = vld [vmem:[#allocation10 + $0x4] sm:$0xf] }
 0x27f   : > { %v908_v46 = vperm.slane %v904_v45, %v2141_v25  ;;  %v909_v47 = vrot.slane %v892_v44, 4  ;;  %v1164_v42 = vld [vmem:[#allocation10 + $0xc] sm:$0xf]  ;;  %v1163_v45 = vld [vmem:[#allocation10 + $0x8] sm:$0xf] }
 0x280   : > { %v888_v48 = vsel %vm589_vm1, 0.0, %v887_v43  ;;  %v893_v50 = vsel %vm589_vm1, %v887_v43, %v868_v35  ;;  %v1188_v43 = vsel %vm1083_vm3, %v1162_v41, 0  ;;  %v1226_v44 = vsel %vm1083_vm3, %v1164_v42, 0 }
 0x281   : > { %v898_v51 = vrot.slane %v888_v48, 4  ;;  %v910_v52 = vsel %vm589_vm1, %v909_v47, %v890_v49  ;;  %v929_v53 = vrot.slane %v908_v46, 4  ;;  %v897_v54 = vperm.slane %v893_v50, %v2141_v25 }
 0x282   : > { %v914_v56 = vperm.slane %v910_v52, %v2141_v25 }
 0x283   : > { %v899_v57 = vsel %vm589_vm1, %v898_v51, %v886_v55  ;;  %v917_v58 = vrot.slane %v897_v54, 4 }
 0x284   : > { %v903_v59 = vperm.slane %v899_v57, %v2141_v25  ;;  %v930_v60 = vsel %vm589_vm1, %v914_v56, %v929_v53  ;;  %v927_v61 = vrot.slane %v914_v56, 4 }
 0x285   : > { %v938_v62 = vperm.slane %v930_v60, %v2150_v38 }
 0x286   : > { %v918_v63 = vsel %vm589_vm1, %v903_v59, %v917_v58  ;;  %v915_v0 = vrot.slane %v903_v59, 4  ;;  %v928_v1 = vsel %vm589_vm1, %v927_v61, %v908_v46  ;;  %v1207_v46 = vsel %vm1083_vm3, %v1163_v45, 0 }
 0x287   : > { %v926_v2 = vperm.slane %v918_v63, %v2150_v38  ;;  %v943_v5 = vrot.slane %v938_v62, 4  ;;  %v934_v7 = vperm.slane %v928_v1, %v2150_v38 }
 0x288   : > { %v916_v8 = vsel %vm589_vm1, %v915_v0, %v897_v54 }
 0x289   : > { %v944_v25 = vsel %vm589_vm1, %v943_v5, %v926_v2  ;;  %v922_v10 = vperm.slane %v916_v8, %v2150_v38  ;;  %v939_v11 = vrot.slane %v934_v7, 4  ;;  %v945_v12 = vrot.slane %v926_v2, 4 }
 0x28a   : > { %v949_v13 = vpack.c.bf16 %v944_v25, %v944_v25 }
 0x28b   : > { %v940_v14 = vsel %vm589_vm1, %v939_v11, %v922_v10  ;;  %v941_v15 = vrot.slane %v922_v10, 4  ;;  %v946_v16 = vsel %vm589_vm1, %v938_v62, %v945_v12 }
 0x28c   : > { %v1123_v17 = vsel %vm1083_vm3, %v949_v13, 0  ;;  %v947_v18 = vpack.c.bf16 %v940_v14, %v940_v14  ;;  %v950_v19 = vpack.c.bf16 %v946_v16, %v946_v16 }
 0x28d   : > { %1132 = vmatpush.bf16.msra.mxu1 %v1123_v17  ;;  %v942_v20 = vsel %vm589_vm1, %v934_v7, %v941_v15 }
 0x28e   : > { %v1085_v21 = vsel %vm1083_vm3, %v947_v18, 0  ;;  %v1142_v38 = vsel %vm1083_vm3, %v950_v19, 0  ;;  %v948_v22 = vpack.c.bf16 %v942_v20, %v942_v20 }
 0x28f   : > { %1094 = vmatpush.bf16.msrb.mxu3 %v1085_v21  ;;  %1151 = vmatpush.bf16.msra.mxu2 %v1142_v38 }
 0x290   : > { %v1104_v23 = vsel %vm1083_vm3, %v948_v22, 0 }
 0x291   : > { %1113 = vmatpush.bf16.msra.mxu0 %v1104_v23  ;;  %1216 = vmatpush.bf16.msrb.mxu1 %v1207_v46 }
 0x293   : > { %1178 = vmatpush.bf16.msra.mxu3 %v1169_v26  ;;  %1235 = vmatpush.bf16.msrb.mxu2 %v1226_v44 }
 0x295   : > { %1197 = vmatpush.bf16.msrb.mxu0 %v1188_v43 }
 0x2da   : > { %v1054_v27 = vpop.xlane.xlu0 %1053 }
 0x2db   : > { %v1063_v28 = vpop.xlane.xlu1 %1062  ;;  %1647 = vrcp.f32 %v1054_v27 }
 0x2dc   : > { %1649 = vrcp.f32 %v1063_v28  ;;  %v1057_v29 = vpop.xlane.xlu2 %1056 }
 0x2dd   : > { %1651 = vrcp.f32 %v1057_v29 }
 0x2e1   : > { %v1648_v30 = vpop.eup %1647 }
 0x2e2   : > { %v1650_v31 = vpop.eup %1649  ;;  %v1068_v32 = vmul.f32 %v1648_v30, %v2242_v3  ;;  %v1060_v33 = vpop.xlane.xlu0 %1059 }
 0x2e3   : > { %v1652_v34 = vpop.eup %1651  ;;  %v1071_v35 = vmul.f32 %v1650_v31, %v2244_v4  ;;  %1653 = vrcp.f32 %v1060_v33 }
 0x2e4   : > { %v1069_v36 = vmul.f32 %v1652_v34, %v2248_v6  ;;  %1072 = vst.msk [vmem:[%s2307_s29] sm:$0xff] %vm951_vm2, %v1068_v32  ;;  %v1076_v37 = vpack.c.bf16 %v1068_v32, %v1068_v32 }
 0x2e5   : > { %1075 = vst.msk [vmem:[%s2307_s29 + $0x18] sm:$0xff] %vm951_vm2, %v1071_v35  ;;  %v1079_v39 = vpack.c.bf16 %v1071_v35, %v1071_v35 }
 0x2e6   : > { %1073 = vst.msk [vmem:[%s2307_s29 + $0x8] sm:$0xff] %vm951_vm2, %v1069_v36  ;;  %v1077_v3 = vpack.c.bf16 %v1069_v36, %v1069_v36  ;;  %1496 = vmatmul.msk.bf16.vlgmr.msrb.gmra.mxu3 %vm951_vm2, %v1076_v37 }
 0x2e7   : > { %1499 = vmatmul.msk.bf16.vlgmr.msra.gmra.mxu2 %vm951_vm2, %v1079_v39 }
 0x2e8   : > { %1497 = vmatmul.msk.bf16.vlgmr.msra.gmra.mxu0 %vm951_vm2, %v1077_v3 }
 0x2e9   : > { %v1654_v4 = vpop.eup %1653 }
 0x2ea   : > { %v1070_v6 = vmul.f32 %v1654_v4, %v2254_v9 }
 0x2ec   : > { %1074 = vst.msk [vmem:[%s2307_s29 + $0x10] sm:$0xff] %vm951_vm2, %v1070_v6  ;;  %v1078_v40 = vpack.c.bf16 %v1070_v6, %v1070_v6 }
 0x2ee   : > { %1498 = vmatmul.msk.bf16.vlgmr.msra.gmra.mxu1 %vm951_vm2, %v1078_v40 }
 0x365   : > { %v1115_v47 = vpop.f32.mrf.mxu0 }
 0x366   : > { %v1158_v9 = vpack.c.bf16 %v1115_v47, %v1115_v47 }
 0x368   : > { %1501 = vmatmul.msk.bf16.vlgmr.msrb.gmra.mxu0 %vm951_vm2, %v1158_v9 }
 0x369   : > { %v1096_v48 = vpop.f32.mrf.mxu3 }
 0x36a   : > { %v1157_v49 = vpack.c.bf16 %v1096_v48, %v1096_v48  ;;  %v1153_v50 = vpop.f32.mrf.mxu2 }
 0x36b   : > { %v1160_v51 = vpack.c.bf16 %v1153_v50, %v1153_v50  ;;  %v1134_v52 = vpop.f32.mrf.mxu1 }
 0x36c   : > { %v1159_v53 = vpack.c.bf16 %v1134_v52, %v1134_v52  ;;  %1500 = vmatmul.msk.bf16.vlgmr.msra.gmra.mxu3 %vm951_vm2, %v1157_v49 }
 0x36d   : > { %v1117_v54 = vpop.f32.mrf.mxu0  ;;  %1503 = vmatmul.msk.bf16.vlgmr.msrb.gmra.mxu2 %vm951_vm2, %v1160_v51 }
 0x36e   : > { %1502 = vmatmul.msk.bf16.vlgmr.msrb.gmra.mxu1 %vm951_vm2, %v1159_v53 }
 0x371   : > { %v1098_v55 = vpop.f32.mrf.mxu3 }
 0x372   : > { %v1155_v56 = vpop.f32.mrf.mxu2 }
 0x373   : > { %v1136_v57 = vpop.f32.mrf.mxu1 }
 0x374   : > { %1832 = shalt.err (!%p1829_p13)
}
 0x375   : > { %s1940_s29 = smov 128   ;;  %s1941_s22 = smov 8   ;;  %v1638_v7 = vld [vmem:[%s2400_s8] ss:$0 sm:$0xff] }
 0x376   : > { %1537 = dma.vmem_to_hbm [thread:$0]  (%p2089_p0), %s1289_s5, 512, %s1291_s7, %s1260_s20, %s1940_s29, %s1940_s29, %s1941_s22  }
 0x377   : > { %s1463_s25 = sshll.u32 %s2109_s28, 3  ;;  %s1506_s21 = sshll.u32 %s1919_s16, 3 }
 0x378   : > { %s1271_s24 = scalar_lea.hbm %s2401_s9, %s1506_s21  ;;  %s465_s16 = scalar_lea.vmem [#allocation11], %s1463_s25 }
 0x379   : > { %s1273_s20 = sshll.u32 %s465_s16, 4  ;;  %s1275_s30 = sshll.u32 %s1271_s24, 4  ;;  %s1274_s20 = int_to_ptr.vmem [resolvable:$true] %s1273_s20  ;;  %s1276_s30 = int_to_ptr.hbm [resolvable:$true] %s1275_s30 }
 0x37a   : > { %s1255_s27 = scalar_lea.sflag [#allocation4], %s2109_s28  ;;  %s1847_s26 = sshra.s32 %s1276_s30, 4  ;;  %s1848_s26 = int_to_ptr.hbm [resolvable:$true] %s1847_s26 }
 0x37b   : > { %s1849_s19 = scalar_lea.hbm %s1848_s26, 8  ;;  %s1853_s22 = scalar_lea.hbm %s2401_s9, 16 }
 0x37c   : > { %p1850_p2 = scmp.ne.s32.totalorder %s1848_s26, %s1849_s19  ;;  %p1854_p11 = scmp.lt.s32.totalorder %s1848_s26, %s2401_s9 }
 0x37d   : > { %p1855_p1 = scmp.lt.s32.totalorder %s1853_s22, %s1849_s19 }
 0x37e   : > { %p1851_p4 = pnand %p1850_p2, %p2089_p0 }
 0x37f   : > { %p1856_p3 = por %p1855_p1, %p1854_p11 }
 0x380   : > { %p1852_p7 = pneg %p1851_p4 }
 0x382   : > { %p1857_p8 = pnand %p1856_p3, %p1852_p7 }
 0x3e5   : > { %v1199_v58 = vpop.f32.mrf.mxu0 }
 0x3e6   : > { %v1242_v62 = vsel %vm495_vm0, %v1199_v58, 0.0 }
 0x3eb   : > { %v1218_v59 = vpop.f32.mrf.mxu1 }
 0x3ec   : > { %v1244_v2 = vsel %vm495_vm0, %v1218_v59, 0.0 }
 0x3ed   : > { %v1201_v60 = vpop.f32.mrf.mxu0 }
 0x3ef   : > { %v1180_v61 = vpop.f32.mrf.mxu3 }
 0x3f0   : > { %v1241_v63 = vsel %vm495_vm0, %v1180_v61, 0.0  ;;  %v1237_v0 = vpop.f32.mrf.mxu2 }
 0x3f1   : > { %v1243_v1 = vadd.f32 %v1242_v62, %v1241_v63  ;;  %v1246_v25 = vsel %vm495_vm0, %v1237_v0, 0.0 }
 0x3f3   : > { %v1245_v5 = vadd.f32 %v1244_v2, %v1243_v1  ;;  %v1220_v8 = vpop.f32.mrf.mxu1 }
 0x3f5   : > { %v1247_v10 = vadd.f32 %v1246_v25, %v1245_v5 }
 0x3f7   : > { %v1252_v11 = vadd.f32 %v1638_v7, %v1247_v10  ;;  %v1182_v12 = vpop.f32.mrf.mxu3 }
 0x3f8   : > { %v1239_v13 = vpop.f32.mrf.mxu2 }
 0x3f9   : > { %1253 = vst.msk [vmem:[%s465_s16] sm:$0xff] %vm495_vm0, %v1252_v11 }
 0x3fa   : > { %1860 = shalt.err (!%p1857_p8)
}
 0x3fb   : > { %1536 = dma.vmem_to_hbm [thread:$0]  (%p2089_p0), %s1274_s20, 128, %s1276_s30, %s1255_s27  }
 0x3fc PF: > { %s1305_s28 = sand.u32 1, %s1907_s13   ;;  %p1558_p9 = pnand %p1454_p6, %p2096_p5 }
 0x3fd   : > { %s1306_s0 = scalar_lea.sflag [#allocation4], %s1305_s28 }
 0x3fe   : > { %p1559_p10 = pneg %p1558_p9 }
 0x400   : > { %1898 = dma.done.wait (%p1559_p10), %s1306_s0, 128  }
 0x401   : > { %1900 = vsyncadd (%p1559_p10), %s1306_s0, 4294967168  ;;  %s1316_s3 = scalar_lea.sflag [#allocation13], %s1305_s28 }
 0x402   : > { %1902 = dma.done.wait (%p1559_p10), %s1316_s3, 512  }
 0x403   : > { %1904 = vsyncadd (%p1559_p10), %s1316_s3, 4294966784  ;;  %s32_s18 = sadd.s32 1, %s1927_s18   ;;  %s2423_s11 = sld [smem:[#allocation19_spill]] }
 0x404   : > { %p29_p12 = scmp.ge.s32.totalorder %s32_s18, 4   ;;  %s2424_s13 = smov %s1911_s14 }
 0x405   : > { %s2425_s14 = smov %s1915_s15  ;;  %s2426_s15 = smov %s2094_s12 }
 0x406   : > { %s2427_s16 = smov %s1923_s17  ;;  %31 = sbr.rel (!%p29_p12) target bundleno = 16 (0x10), region = 134 }
 0x409   : > { %s2428_s17 = smov %s2423_s11 }
 0x40b   :  { %1322 = vsyncpa [#allocation3], 1 }
 0x40c   :  { %1324 = vsyncpa [#allocation3 + $0x1], 1 }
 0x40d   :  { %1325 = vsyncpa [#allocation6], 1 }
 0x40e   :  { %1326 = vsyncpa [#allocation9], 1 }
 0x40f   :  { %1327 = vsyncpa [#allocation4], 1 }
 0x410   :  { %1329 = vsyncpa [#allocation4 + $0x1], 1 }
 0x411   :  { %1330 = vsyncpa [#allocation13], 1 }
 0x412   :  { %1332 = vsyncpa [#allocation13 + $0x1], 1 }

</bundles_post_ra>
